<compile_context>
chip_gen: v7x
topology: tpu7x:2x2x1
jax: 0.10.0
libtpu: 0.0.40
codegen_flags: <defaults>
</compile_context>

<pallas_src>
import jax
import jax.numpy as jnp
from jax import lax
from jax.experimental import pallas as pl
from jax.experimental.pallas import tpu as pltpu

# ----------------------- model dimensions (small) ---------------------------
B, T = 2, 8           # batch, sequence length
BT = B * T            # folded batch*seq rows (sublane dim of every activation)
D_TRANS = 64          # translator hidden dim
D_LLM = 128           # LLM hidden dim
H_BRIDGE = 128        # bridge (transformer1/2) MLP hidden dim
VOCAB_IN = 100        # source-language vocab (embedding table)
VOCAB_PAD = 128       # embedding table padded to an MXU-friendly 128 rows
VOCAB_OUT = 256       # target-language vocab (output logits)
BIAS_SLAB = 768       # packed bias slab width (128-aligned sub-slots)
ATTN_SCALE = 1.0 / float(D_LLM) ** 0.5
NEG_BIG = -1e30       # f32-safe "minus infinity" for masked attention scores


# ----------------------- fused forward kernel --------------------------------
def _fused_forward_kernel(
    onehot_ref,                                  # (BT, VOCAB_PAD) bf16
    attn_bias_ref,                               # (BT, BT) f32 block-diag + key mask
    row_mask_ref,                                # (BT, 1) f32
    emb_w1_ref,                                  # (VOCAB_PAD, H_BRIDGE) bf16 (emb @ t1_w1 fold)
    t1_w2_ref,                                   # (H_BRIDGE, D_LLM) bf16
    wqkv_ref, wo_ref,                            # frozen LLM block, bf16
    t2_w1_ref, t2_w2_ref,                        # bridge transformer2, bf16
    dec_w_ref,                                   # (D_TRANS, VOCAB_OUT) bf16 (EOS/mean fold)
    bias_ref,                                    # (1, BIAS_SLAB) f32 packed biases
    o_ref,                                       # (BT, VOCAB_OUT) f32
):
    f32, bf16 = jnp.float32, jnp.bfloat16

    # packed biases: 128-lane-aligned static slices of the slab ref.
    t1_b1 = bias_ref[:, 0:H_BRIDGE]                   # (1, 128)
    t1_b2 = bias_ref[:, 128:128 + D_LLM]              # (1, 128)
    t2_b1 = bias_ref[:, 256:256 + H_BRIDGE]           # (1, 128)
    t2_b2 = bias_ref[:, 384:384 + D_TRANS]            # (1, 64)
    dec_b = bias_ref[:, 512:512 + VOCAB_OUT]          # (1, 256)

    # 1+2) frozen translator encoder + transformer1 first layer (emb folded in):
    #      onehot @ (emb @ W1) + b1
    h1 = jnp.dot(onehot_ref[...], emb_w1_ref[...],
                 preferred_element_type=f32) + t1_b1               # (BT, H_BRIDGE)
    h1 = jax.nn.gelu(h1, approximate=True)
    x_llm = jnp.dot(h1.astype(bf16), t1_w2_ref[...],
                    preferred_element_type=f32) + t1_b2            # (BT, D_LLM)

    # 3) frozen LLM block: single-head masked self-attention + residual.
    #    Batches are folded into the row dim; the precomputed additive bias is
    #    block-diagonal so rows never attend across batches or to padded keys.
    xb = x_llm.astype(bf16)
    qkv = jnp.dot(xb, wqkv_ref[...], preferred_element_type=f32)   # (BT, 3*D_LLM)
    q = qkv[:, :D_LLM].astype(bf16)
    k = qkv[:, D_LLM:2 * D_LLM].astype(bf16)
    v = qkv[:, 2 * D_LLM:].astype(bf16)
    s = lax.dot_general(q, k, (((1,), (1,)), ((), ())),
                        preferred_element_type=f32) * ATTN_SCALE   # (BT, BT)
    s = s + attn_bias_ref[...]
    s = s - jnp.max(s, axis=-1, keepdims=True)
    p = jnp.exp(s)
    p = p / jnp.sum(p, axis=-1, keepdims=True)                     # exact softmax
    ctx = jnp.dot(p.astype(bf16), v, preferred_element_type=f32)
    attn = jnp.dot(ctx.astype(bf16), wo_ref[...], preferred_element_type=f32)
    x_res = x_llm + attn                                           # (BT, D_LLM)

    # 4) transformer2 bridge: D_LLM -> D_TRANS
    h2 = jnp.dot(x_res.astype(bf16), t2_w1_ref[...],
                 preferred_element_type=f32) + t2_b1
    h2 = jax.nn.gelu(h2, approximate=True)
    t2_out = jnp.dot(h2.astype(bf16), t2_w2_ref[...],
                     preferred_element_type=f32) + t2_b2           # (BT, D_TRANS)

    # 5) decoder vocab head (EOS concat + mean already folded into dec_w/dec_b),
    #    masked rows zeroed -> padded-logits layout.
    logits = jnp.dot(t2_out.astype(bf16), dec_w_ref[...],
                     preferred_element_type=f32) + dec_b           # (BT, VOCAB_OUT)
    o_ref[...] = (logits * row_mask_ref[...]).astype(o_ref.dtype)


def fused_forward(kp, onehot, attn_bias, row_mask):
    r2 = lambda i: (0, 0)
    return pl.pallas_call(
        _fused_forward_kernel,
        out_shape=jax.ShapeDtypeStruct((BT, VOCAB_OUT), jnp.float32),
        grid_spec=pltpu.PrefetchScalarGridSpec(
            num_scalar_prefetch=0,
            grid=(1,),                                  # single step: no pipeline overhead
            in_specs=[
                pl.BlockSpec((BT, VOCAB_PAD), r2),      # onehot tokens
                pl.BlockSpec((BT, BT), r2),             # block-diagonal attention bias
                pl.BlockSpec((BT, 1), r2),              # row (output) mask
                pl.BlockSpec((VOCAB_PAD, H_BRIDGE), r2),# emb @ t1_w1 (folded)
                pl.BlockSpec((H_BRIDGE, D_LLM), r2),    # t1_w2
                pl.BlockSpec((D_LLM, 3 * D_LLM), r2),   # w_qkv
                pl.BlockSpec((D_LLM, D_LLM), r2),       # w_o
                pl.BlockSpec((D_LLM, H_BRIDGE), r2),    # t2_w1
                pl.BlockSpec((H_BRIDGE, D_TRANS), r2),  # t2_w2
                pl.BlockSpec((D_TRANS, VOCAB_OUT), r2), # dec_w (folded)
                pl.BlockSpec((1, BIAS_SLAB), r2),       # packed biases
            ],
            out_specs=pl.BlockSpec((BT, VOCAB_OUT), r2),
        ),
        compiler_params=pltpu.CompilerParams(
            dimension_semantics=("arbitrary",)),
    )(
        onehot, attn_bias, row_mask,
        kp["emb_w1"], kp["t1_w2"], kp["w_qkv"], kp["w_o"],
        kp["t2_w1"], kp["t2_w2"], kp["dec_w"], kp["bias_slab"],
    )


@jax.jit
def my_custom_model_forward(kernel_params, input_ids, input_attention_mask):
    """Returns padded logits [B, T, VOCAB_OUT]; masked positions are all-zero."""
    # Tiny host-side (XLA) layout prep — replaces the serial in-kernel SMEM
    # select chains so the first MXU push issues immediately.
    ids_flat = input_ids.reshape(-1)
    onehot = jax.nn.one_hot(ids_flat, VOCAB_PAD, dtype=jnp.bfloat16)     # (BT, 128)
    batch_idx = jnp.arange(BT, dtype=jnp.int32) // T
    same_batch = batch_idx[:, None] == batch_idx[None, :]
    key_ok = input_attention_mask.reshape(-1) > 0
    attn_bias = jnp.where(same_batch & key_ok[None, :], 0.0, NEG_BIG
                          ).astype(jnp.float32)                          # (BT, BT)
    row_mask = input_attention_mask.reshape(BT, 1).astype(jnp.float32)   # (BT, 1)

    flat_logits = fused_forward(kernel_params, onehot, attn_bias, row_mask)
    return flat_logits.reshape(B, T, VOCAB_OUT)   # free metadata reshape


# ----------------------- parameters (deterministic) ---------------------------
def init_params(seed=0):
    keys = jax.random.split(jax.random.PRNGKey(seed), 16)
    n = lambda k, shape, s=0.02: (s * jax.random.normal(k, shape)).astype(jnp.float32)
    return {
        # frozen translator encoder (embedding-table stand-in)
        "trans_emb": n(keys[0], (VOCAB_IN, D_TRANS), 0.1),
        # transformer1: translator-dim -> llm-dim bridge
        "t1_w1": n(keys[1], (D_TRANS, H_BRIDGE)),
        "t1_b1": jnp.zeros((1, H_BRIDGE), jnp.float32),
        "t1_w2": n(keys[2], (H_BRIDGE, D_LLM)),
        "t1_b2": jnp.zeros((1, D_LLM), jnp.float32),
        # frozen LLM block (single-head self-attention)
        "llm_wq": n(keys[3], (D_LLM, D_LLM)),
        "llm_wk": n(keys[4], (D_LLM, D_LLM)),
        "llm_wv": n(keys[5], (D_LLM, D_LLM)),
        "llm_wo": n(keys[6], (D_LLM, D_LLM)),
        # transformer2: llm-dim -> translator-dim bridge
        "t2_w1": n(keys[7], (D_LLM, H_BRIDGE)),
        "t2_b1": jnp.zeros((1, H_BRIDGE), jnp.float32),
        "t2_w2": n(keys[8], (H_BRIDGE, D_TRANS)),
        "t2_b2": jnp.zeros((1, D_TRANS), jnp.float32),
        # frozen EOS hidden-state vector (create_eos_vector stand-in)
        "eos_vector": n(keys[9], (1, 4, D_TRANS), 0.1),
        # frozen translator decoder vocab head
        "dec_w": n(keys[10], (D_TRANS, VOCAB_OUT)),
        "dec_b": jnp.zeros((1, VOCAB_OUT), jnp.float32),
    }


def prepare_kernel_params(p):
    """One-time fold + pack of module params into kernel-ready (bf16 MXU) form."""
    bf16 = lambda w: w.astype(jnp.bfloat16)

    # pad the embedding table to 128 rows, then fold it into transformer1's W1:
    #   (onehot @ emb) @ W1 == onehot @ (emb @ W1)
    emb = jnp.zeros((VOCAB_PAD, D_TRANS), jnp.float32).at[:VOCAB_IN].set(p["trans_emb"])
    emb_w1 = emb @ p["t1_w1"]                                   # (VOCAB_PAD, H_BRIDGE)

    # concat QKV: one wide MXU weight push instead of three narrow ones
    w_qkv = jnp.concatenate([p["llm_wq"], p["llm_wk"], p["llm_wv"]], axis=1)

    # fold EOS concat + mean into the decoder head:
    #   mean([t2, eos_last]) @ W + b == t2 @ (0.5*W) + (b + 0.5 * eos_last @ W)
    eos_last = p["eos_vector"][:, -1, :]                        # (1, D_TRANS)
    dec_w_eff = 0.5 * p["dec_w"]
    dec_b_eff = p["dec_b"] + 0.5 * (eos_last @ p["dec_w"])      # (1, VOCAB_OUT), f32

    # pack all bias vectors into one (1, 768) f32 slab at 128-aligned offsets
    bias_slab = jnp.zeros((1, BIAS_SLAB), jnp.float32)
    bias_slab = bias_slab.at[:, 0:H_BRIDGE].set(p["t1_b1"])
    bias_slab = bias_slab.at[:, 128:128 + D_LLM].set(p["t1_b2"])
    bias_slab = bias_slab.at[:, 256:256 + H_BRIDGE].set(p["t2_b1"])
    bias_slab = bias_slab.at[:, 384:384 + D_TRANS].set(p["t2_b2"])
    bias_slab = bias_slab.at[:, 512:512 + VOCAB_OUT].set(dec_b_eff)

    return {
        "emb_w1": bf16(emb_w1),
        "t1_w2": bf16(p["t1_w2"]),
        "w_qkv": bf16(w_qkv),
        "w_o": bf16(p["llm_wo"]),
        "t2_w1": bf16(p["t2_w1"]),
        "t2_w2": bf16(p["t2_w2"]),
        "dec_w": bf16(dec_w_eff),
        "bias_slab": bias_slab,
    }


# TODO(synk): the real frozen Marian decoder over injected hidden states and the
# nonzero-index gather/scatter are replaced by a per-position vocab head with
# in-kernel mask zeroing (equivalent padded-logits layout).

# ----------------------- main --------------------------------------------------
if __name__ == "__main__":
    key = jax.random.PRNGKey(0)
    k_ids, _ = jax.random.split(key)
    input_ids = jax.random.randint(k_ids, (B, T), 0, VOCAB_IN, dtype=jnp.int32)
    # attention mask: second sequence is padded on its last 3 positions
    input_attention_mask = jnp.array(
        [[1] * T, [1] * (T - 3) + [0] * 3], dtype=jnp.int32)

    params = init_params(0)
    kernel_params = prepare_kernel_params(params)

    logits = my_custom_model_forward(kernel_params, input_ids, input_attention_mask)
    logits = jax.block_until_ready(logits)

    assert logits.shape == (B, T, VOCAB_OUT)
    assert bool(jnp.all(logits[1, T - 1] == 0.0))  # masked position is zero-padded
    print("KERNEL_OK")
</pallas_src>

<mosaic_0001>
module attributes {stable_mosaic.version = 11 : i64} {
  func.func @_fused_forward_kernel(%arg0: i32, %arg1: memref<16x128xbf16, #tpu.memory_space<vmem>>, %arg2: memref<16x16xf32, #tpu.memory_space<vmem>>, %arg3: memref<16x1xf32, #tpu.memory_space<vmem>>, %arg4: memref<128x128xbf16, #tpu.memory_space<vmem>>, %arg5: memref<128x128xbf16, #tpu.memory_space<vmem>>, %arg6: memref<128x384xbf16, #tpu.memory_space<vmem>>, %arg7: memref<128x128xbf16, #tpu.memory_space<vmem>>, %arg8: memref<128x128xbf16, #tpu.memory_space<vmem>>, %arg9: memref<128x64xbf16, #tpu.memory_space<vmem>>, %arg10: memref<64x256xbf16, #tpu.memory_space<vmem>>, %arg11: memref<1x768xf32, #tpu.memory_space<vmem>>, %arg12: memref<16x256xf32, #tpu.memory_space<vmem>>) attributes {dimension_semantics = [#tpu.dimension_semantics<arbitrary>], iteration_bounds = array<i64: 1>, scalar_prefetch = 0 : i64, scratch_operands = 0 : i64, tpu.core_type = #tpu.core_type<tc>, window_params = [{pipeline_mode = #tpu.pipeline_mode<synchronous>, transform_indices = @transform_0, window_bounds = array<i64: 16, 128>}, {pipeline_mode = #tpu.pipeline_mode<synchronous>, transform_indices = @transform_1, window_bounds = array<i64: 16, 16>}, {pipeline_mode = #tpu.pipeline_mode<synchronous>, transform_indices = @transform_2, window_bounds = array<i64: 16, 1>}, {pipeline_mode = #tpu.pipeline_mode<synchronous>, transform_indices = @transform_3, window_bounds = array<i64: 128, 128>}, {pipeline_mode = #tpu.pipeline_mode<synchronous>, transform_indices = @transform_4, window_bounds = array<i64: 128, 128>}, {pipeline_mode = #tpu.pipeline_mode<synchronous>, transform_indices = @transform_5, window_bounds = array<i64: 128, 384>}, {pipeline_mode = #tpu.pipeline_mode<synchronous>, transform_indices = @transform_6, window_bounds = array<i64: 128, 128>}, {pipeline_mode = #tpu.pipeline_mode<synchronous>, transform_indices = @transform_7, window_bounds = array<i64: 128, 128>}, {pipeline_mode = #tpu.pipeline_mode<synchronous>, transform_indices = @transform_8, window_bounds = array<i64: 128, 64>}, {pipeline_mode = #tpu.pipeline_mode<synchronous>, transform_indices = @transform_9, window_bounds = array<i64: 64, 256>}, {pipeline_mode = #tpu.pipeline_mode<synchronous>, transform_indices = @transform_10, window_bounds = array<i64: 1, 768>}, {pipeline_mode = #tpu.pipeline_mode<synchronous>, transform_indices = @transform_11, window_bounds = array<i64: 16, 256>}]} {
    %c0 = arith.constant 0 : index
    %c0_0 = arith.constant 0 : index
    %0 = vector.load %arg11[%c0, %c0_0] : memref<1x768xf32, #tpu.memory_space<vmem>>, vector<1x128xf32>
    %c0_1 = arith.constant 0 : index
    %c128 = arith.constant 128 : index
    %1 = vector.load %arg11[%c0_1, %c128] : memref<1x768xf32, #tpu.memory_space<vmem>>, vector<1x128xf32>
    %c0_2 = arith.constant 0 : index
    %c256 = arith.constant 256 : index
    %2 = vector.load %arg11[%c0_2, %c256] : memref<1x768xf32, #tpu.memory_space<vmem>>, vector<1x128xf32>
    %c0_3 = arith.constant 0 : index
    %c384 = arith.constant 384 : index
    %3 = vector.load %arg11[%c0_3, %c384] : memref<1x768xf32, #tpu.memory_space<vmem>>, vector<1x64xf32>
    %c0_4 = arith.constant 0 : index
    %c512 = arith.constant 512 : index
    %4 = vector.load %arg11[%c0_4, %c512] : memref<1x768xf32, #tpu.memory_space<vmem>>, vector<1x256xf32>
    %c0_5 = arith.constant 0 : index
    %c0_6 = arith.constant 0 : index
    %5 = vector.load %arg1[%c0_5, %c0_6] : memref<16x128xbf16, #tpu.memory_space<vmem>>, vector<16x128xbf16>
    %c0_7 = arith.constant 0 : index
    %c0_8 = arith.constant 0 : index
    %6 = vector.load %arg4[%c0_7, %c0_8] : memref<128x128xbf16, #tpu.memory_space<vmem>>, vector<128x128xbf16>
    %cst = arith.constant dense<0.000000e+00> : vector<16x128xf32>
    %7 = tpu.matmul %5, %6, %cst {dimension_numbers = #tpu.dot_dimension_numbers<[1], [0], [0], [1], [0, 0, 1, 1], [], []>} : vector<16x128xbf16>, vector<128x128xbf16>, vector<16x128xf32> -> vector<16x128xf32>
    %8 = vector.broadcast %0 : vector<1x128xf32> to vector<16x128xf32>
    %9 = arith.addf %7, %8 : vector<16x128xf32>
    %10 = arith.mulf %9, %9 : vector<16x128xf32>
    %11 = arith.mulf %9, %10 : vector<16x128xf32>
    %cst_9 = arith.constant 4.471500e-02 : f32
    %12 = vector.broadcast %cst_9 : f32 to vector<16x128xf32>
    %13 = arith.mulf %12, %11 : vector<16x128xf32>
    %14 = arith.addf %9, %13 : vector<16x128xf32>
    %cst_10 = arith.constant 0.797884583 : f32
    %15 = vector.broadcast %cst_10 : f32 to vector<16x128xf32>
    %16 = arith.mulf %15, %14 : vector<16x128xf32>
    %17 = math.tanh %16 : vector<16x128xf32>
    %cst_11 = arith.constant 1.000000e+00 : f32
    %18 = vector.broadcast %cst_11 : f32 to vector<16x128xf32>
    %19 = arith.addf %18, %17 : vector<16x128xf32>
    %cst_12 = arith.constant 5.000000e-01 : f32
    %20 = vector.broadcast %cst_12 : f32 to vector<16x128xf32>
    %21 = arith.mulf %20, %19 : vector<16x128xf32>
    %22 = arith.mulf %9, %21 : vector<16x128xf32>
    %23 = arith.truncf %22 : vector<16x128xf32> to vector<16x128xbf16>
    %c0_13 = arith.constant 0 : index
    %c0_14 = arith.constant 0 : index
    %24 = vector.load %arg5[%c0_13, %c0_14] : memref<128x128xbf16, #tpu.memory_space<vmem>>, vector<128x128xbf16>
    %cst_15 = arith.constant dense<0.000000e+00> : vector<16x128xf32>
    %25 = tpu.matmul %23, %24, %cst_15 {dimension_numbers = #tpu.dot_dimension_numbers<[1], [0], [0], [1], [0, 0, 1, 1], [], []>} : vector<16x128xbf16>, vector<128x128xbf16>, vector<16x128xf32> -> vector<16x128xf32>
    %26 = vector.broadcast %1 : vector<1x128xf32> to vector<16x128xf32>
    %27 = arith.addf %25, %26 : vector<16x128xf32>
    %28 = arith.truncf %27 : vector<16x128xf32> to vector<16x128xbf16>
    %c0_16 = arith.constant 0 : index
    %c0_17 = arith.constant 0 : index
    %29 = vector.load %arg6[%c0_16, %c0_17] : memref<128x384xbf16, #tpu.memory_space<vmem>>, vector<128x384xbf16>
    %cst_18 = arith.constant dense<0.000000e+00> : vector<16x384xf32>
    %30 = tpu.matmul %28, %29, %cst_18 {dimension_numbers = #tpu.dot_dimension_numbers<[1], [0], [0], [1], [0, 0, 1, 1], [], []>} : vector<16x128xbf16>, vector<128x384xbf16>, vector<16x384xf32> -> vector<16x384xf32>
    %31 = vector.extract_strided_slice %30 {offsets = [0, 0], sizes = [16, 128], strides = [1, 1]} : vector<16x384xf32> to vector<16x128xf32>
    %32 = arith.truncf %31 : vector<16x128xf32> to vector<16x128xbf16>
    %33 = vector.extract_strided_slice %30 {offsets = [0, 128], sizes = [16, 128], strides = [1, 1]} : vector<16x384xf32> to vector<16x128xf32>
    %34 = arith.truncf %33 : vector<16x128xf32> to vector<16x128xbf16>
    %35 = vector.extract_strided_slice %30 {offsets = [0, 256], sizes = [16, 128], strides = [1, 1]} : vector<16x384xf32> to vector<16x128xf32>
    %36 = arith.truncf %35 : vector<16x128xf32> to vector<16x128xbf16>
    %cst_19 = arith.constant dense<0.000000e+00> : vector<16x16xf32>
    %37 = tpu.matmul %32, %34, %cst_19 {dimension_numbers = #tpu.dot_dimension_numbers<[1], [1], [0], [0], [0, 0, 1, 0], [], []>} : vector<16x128xbf16>, vector<16x128xbf16>, vector<16x16xf32> -> vector<16x16xf32>
    %cst_20 = arith.constant 0.0883883461 : f32
    %38 = vector.broadcast %cst_20 : f32 to vector<16x16xf32>
    %39 = arith.mulf %37, %38 : vector<16x16xf32>
    %c0_21 = arith.constant 0 : index
    %c0_22 = arith.constant 0 : index
    %40 = vector.load %arg2[%c0_21, %c0_22] : memref<16x16xf32, #tpu.memory_space<vmem>>, vector<16x16xf32>
    %41 = arith.addf %39, %40 : vector<16x16xf32>
    %cst_23 = arith.constant dense<0xFF800000> : vector<16xf32>
    %42 = vector.multi_reduction <maximumf>, %41, %cst_23 [1] : vector<16x16xf32> to vector<16xf32>
    %43 = vector.shape_cast %42 : vector<16xf32> to vector<16x1xf32>
    %44 = vector.broadcast %43 : vector<16x1xf32> to vector<16x16xf32>
    %45 = arith.subf %41, %44 : vector<16x16xf32>
    %46 = math.exp %45 : vector<16x16xf32>
    %cst_24 = arith.constant dense<0.000000e+00> : vector<16xf32>
    %47 = vector.multi_reduction <add>, %46, %cst_24 [1] : vector<16x16xf32> to vector<16xf32>
    %48 = vector.shape_cast %47 : vector<16xf32> to vector<16x1xf32>
    %49 = vector.broadcast %48 : vector<16x1xf32> to vector<16x16xf32>
    %50 = arith.divf %46, %49 : vector<16x16xf32>
    %51 = arith.truncf %50 : vector<16x16xf32> to vector<16x16xbf16>
    %cst_25 = arith.constant dense<0.000000e+00> : vector<16x128xf32>
    %52 = tpu.matmul %51, %36, %cst_25 {dimension_numbers = #tpu.dot_dimension_numbers<[1], [0], [0], [1], [0, 0, 1, 1], [], []>} : vector<16x16xbf16>, vector<16x128xbf16>, vector<16x128xf32> -> vector<16x128xf32>
    %53 = arith.truncf %52 : vector<16x128xf32> to vector<16x128xbf16>
    %c0_26 = arith.constant 0 : index
    %c0_27 = arith.constant 0 : index
    %54 = vector.load %arg7[%c0_26, %c0_27] : memref<128x128xbf16, #tpu.memory_space<vmem>>, vector<128x128xbf16>
    %cst_28 = arith.constant dense<0.000000e+00> : vector<16x128xf32>
    %55 = tpu.matmul %53, %54, %cst_28 {dimension_numbers = #tpu.dot_dimension_numbers<[1], [0], [0], [1], [0, 0, 1, 1], [], []>} : vector<16x128xbf16>, vector<128x128xbf16>, vector<16x128xf32> -> vector<16x128xf32>
    %56 = arith.addf %27, %55 : vector<16x128xf32>
    %57 = arith.truncf %56 : vector<16x128xf32> to vector<16x128xbf16>
    %c0_29 = arith.constant 0 : index
    %c0_30 = arith.constant 0 : index
    %58 = vector.load %arg8[%c0_29, %c0_30] : memref<128x128xbf16, #tpu.memory_space<vmem>>, vector<128x128xbf16>
    %cst_31 = arith.constant dense<0.000000e+00> : vector<16x128xf32>
    %59 = tpu.matmul %57, %58, %cst_31 {dimension_numbers = #tpu.dot_dimension_numbers<[1], [0], [0], [1], [0, 0, 1, 1], [], []>} : vector<16x128xbf16>, vector<128x128xbf16>, vector<16x128xf32> -> vector<16x128xf32>
    %60 = vector.broadcast %2 : vector<1x128xf32> to vector<16x128xf32>
    %61 = arith.addf %59, %60 : vector<16x128xf32>
    %62 = arith.mulf %61, %61 : vector<16x128xf32>
    %63 = arith.mulf %61, %62 : vector<16x128xf32>
    %cst_32 = arith.constant 4.471500e-02 : f32
    %64 = vector.broadcast %cst_32 : f32 to vector<16x128xf32>
    %65 = arith.mulf %64, %63 : vector<16x128xf32>
    %66 = arith.addf %61, %65 : vector<16x128xf32>
    %cst_33 = arith.constant 0.797884583 : f32
    %67 = vector.broadcast %cst_33 : f32 to vector<16x128xf32>
    %68 = arith.mulf %67, %66 : vector<16x128xf32>
    %69 = math.tanh %68 : vector<16x128xf32>
    %cst_34 = arith.constant 1.000000e+00 : f32
    %70 = vector.broadcast %cst_34 : f32 to vector<16x128xf32>
    %71 = arith.addf %70, %69 : vector<16x128xf32>
    %cst_35 = arith.constant 5.000000e-01 : f32
    %72 = vector.broadcast %cst_35 : f32 to vector<16x128xf32>
    %73 = arith.mulf %72, %71 : vector<16x128xf32>
    %74 = arith.mulf %61, %73 : vector<16x128xf32>
    %75 = arith.truncf %74 : vector<16x128xf32> to vector<16x128xbf16>
    %c0_36 = arith.constant 0 : index
    %c0_37 = arith.constant 0 : index
    %76 = vector.load %arg9[%c0_36, %c0_37] : memref<128x64xbf16, #tpu.memory_space<vmem>>, vector<128x64xbf16>
    %cst_38 = arith.constant dense<0.000000e+00> : vector<16x64xf32>
    %77 = tpu.matmul %75, %76, %cst_38 {dimension_numbers = #tpu.dot_dimension_numbers<[1], [0], [0], [1], [0, 0, 1, 1], [], []>} : vector<16x128xbf16>, vector<128x64xbf16>, vector<16x64xf32> -> vector<16x64xf32>
    %78 = vector.broadcast %3 : vector<1x64xf32> to vector<16x64xf32>
    %79 = arith.addf %77, %78 : vector<16x64xf32>
    %80 = arith.truncf %79 : vector<16x64xf32> to vector<16x64xbf16>
    %c0_39 = arith.constant 0 : index
    %c0_40 = arith.constant 0 : index
    %81 = vector.load %arg10[%c0_39, %c0_40] : memref<64x256xbf16, #tpu.memory_space<vmem>>, vector<64x256xbf16>
    %cst_41 = arith.constant dense<0.000000e+00> : vector<16x256xf32>
    %82 = tpu.matmul %80, %81, %cst_41 {dimension_numbers = #tpu.dot_dimension_numbers<[1], [0], [0], [1], [0, 0, 1, 1], [], []>} : vector<16x64xbf16>, vector<64x256xbf16>, vector<16x256xf32> -> vector<16x256xf32>
    %83 = vector.broadcast %4 : vector<1x256xf32> to vector<16x256xf32>
    %84 = arith.addf %82, %83 : vector<16x256xf32>
    %c0_42 = arith.constant 0 : index
    %c0_43 = arith.constant 0 : index
    %85 = vector.load %arg3[%c0_42, %c0_43] : memref<16x1xf32, #tpu.memory_space<vmem>>, vector<16x1xf32>
    %86 = vector.broadcast %85 : vector<16x1xf32> to vector<16x256xf32>
    %87 = arith.mulf %84, %86 : vector<16x256xf32>
    %c0_44 = arith.constant 0 : index
    %c0_45 = arith.constant 0 : index
    %88 = vector.load %arg12[%c0_44, %c0_45] : memref<16x256xf32, #tpu.memory_space<vmem>>, vector<16x256xf32>
    tpu.vector_store %arg12[%c0_44, %c0_45], %87 {strides = array<i32>} : memref<16x256xf32, #tpu.memory_space<vmem>>, vector<16x256xf32>,
    return
  }
  func.func @transform_0(%arg0: i32) -> (i32, i32) {
    %c0_i32 = arith.constant 0 : i32
    %c0_i32_0 = arith.constant 0 : i32
    %c0_i32_1 = arith.constant 0 : i32
    return %c0_i32, %c0_i32_0 : i32, i32
  }
  func.func @transform_1(%arg0: i32) -> (i32, i32) {
    %c0_i32 = arith.constant 0 : i32
    %c0_i32_0 = arith.constant 0 : i32
    %c0_i32_1 = arith.constant 0 : i32
    return %c0_i32, %c0_i32_0 : i32, i32
  }
  func.func @transform_2(%arg0: i32) -> (i32, i32) {
    %c0_i32 = arith.constant 0 : i32
    %c0_i32_0 = arith.constant 0 : i32
    %c0_i32_1 = arith.constant 0 : i32
    return %c0_i32, %c0_i32_0 : i32, i32
  }
  func.func @transform_3(%arg0: i32) -> (i32, i32) {
    %c0_i32 = arith.constant 0 : i32
    %c0_i32_0 = arith.constant 0 : i32
    %c0_i32_1 = arith.constant 0 : i32
    return %c0_i32, %c0_i32_0 : i32, i32
  }
  func.func @transform_4(%arg0: i32) -> (i32, i32) {
    %c0_i32 = arith.constant 0 : i32
    %c0_i32_0 = arith.constant 0 : i32
    %c0_i32_1 = arith.constant 0 : i32
    return %c0_i32, %c0_i32_0 : i32, i32
  }
  func.func @transform_5(%arg0: i32) -> (i32, i32) {
    %c0_i32 = arith.constant 0 : i32
    %c0_i32_0 = arith.constant 0 : i32
    %c0_i32_1 = arith.constant 0 : i32
    return %c0_i32, %c0_i32_0 : i32, i32
  }
  func.func @transform_6(%arg0: i32) -> (i32, i32) {
    %c0_i32 = arith.constant 0 : i32
    %c0_i32_0 = arith.constant 0 : i32
    %c0_i32_1 = arith.constant 0 : i32
    return %c0_i32, %c0_i32_0 : i32, i32
  }
  func.func @transform_7(%arg0: i32) -> (i32, i32) {
    %c0_i32 = arith.constant 0 : i32
    %c0_i32_0 = arith.constant 0 : i32
    %c0_i32_1 = arith.constant 0 : i32
    return %c0_i32, %c0_i32_0 : i32, i32
  }
  func.func @transform_8(%arg0: i32) -> (i32, i32) {
    %c0_i32 = arith.constant 0 : i32
    %c0_i32_0 = arith.constant 0 : i32
    %c0_i32_1 = arith.constant 0 : i32
    return %c0_i32, %c0_i32_0 : i32, i32
  }
  func.func @transform_9(%arg0: i32) -> (i32, i32) {
    %c0_i32 = arith.constant 0 : i32
    %c0_i32_0 = arith.constant 0 : i32
    %c0_i32_1 = arith.constant 0 : i32
    return %c0_i32, %c0_i32_0 : i32, i32
  }
  func.func @transform_10(%arg0: i32) -> (i32, i32) {
    %c0_i32 = arith.constant 0 : i32
    %c0_i32_0 = arith.constant 0 : i32
    %c0_i32_1 = arith.constant 0 : i32
    return %c0_i32, %c0_i32_0 : i32, i32
  }
  func.func @transform_11(%arg0: i32) -> (i32, i32) {
    %c0_i32 = arith.constant 0 : i32
    %c0_i32_0 = arith.constant 0 : i32
    %c0_i32_1 = arith.constant 0 : i32
    return %c0_i32, %c0_i32_0 : i32, i32
  }
}

</mosaic_0001>

<bundles_post_ra>
// kernel: eq.1
= control target key start
LH: loop header
LB: loop body
LE: loop exit
PB: predicated region body
PF: predicated region fallthrough
CT: control target
= control target key end

     0   :  { %vm7_vm0 = vcmask 64512   ;;  %vm13_vm1 = vcmask 130112   ;;  %s39_s0 = inlined_call_operand.vmem [shape: s32[2,8], index: 0, kind: input, shape index: {}]   ;;  %s40_s1 = inlined_call_operand.vmem [shape: s32[16], index: 1, kind: output, shape index: {}]  }
   0x1   :  { %v4_v0 = vld [vmem:[%s39_s0] sm:$0x3]  ;;  %s22_s0 = smov 8  }
   0x2   :  { %5 = vst [vmem:[#allocation1] sm:$0x3] %v4_v0 }
   0x9   :  { %v10_v1 = vld [vmem:[#allocation1 + $0x1] sm:$0x1]   ;;  %v6_v2 = vld [vmem:[#allocation1] sm:$0x1]  }
   0xa   :  { %11 = vrot.lane.b32.xlu0 %v10_v1, %s22_s0  ;;  %8 = vst.msk [vmem:[#allocation0] sm:$0x1] %vm7_vm0, %v6_v2  }
  0x7c   :  { %v12_v3 = vpop.permute.xlu0 %11  }
  0x7d   :  { %14 = vst.msk [vmem:[#allocation0] sm:$0x1] %vm13_vm1, %v12_v3  }
  0x84   :  { %v18_v4 = vld [vmem:[#allocation0] sm:$0x1] }
  0x85   :  { %20 = vst [vmem:[%s40_s1] sm:$0x1] %v18_v4 }

// kernel: my_custom_model_forward.1
= control target key start
LH: loop header
LB: loop body
LE: loop exit
PB: predicated region body
PF: predicated region fallthrough
CT: control target
= control target key end

     0   :  { %16 = vsyncpa [#allocation3], 0  ;;  %s2073_s0 = inlined_call_operand.vmem [shape: bf16[16,128], index: 0, kind: input, shape index: {}]   ;;  %s2074_s1 = inlined_call_operand.vmem [shape: f32[16,16], index: 1, kind: input, shape index: {}]   ;;  %s2075_s2 = inlined_call_operand.vmem [shape: f32[16,1], index: 2, kind: input, shape index: {}]   ;;  %s2076_s3 = inlined_call_operand.vmem [shape: bf16[128,128], index: 3, kind: input, shape index: {}]   ;;  %s2077_s4 = inlined_call_operand.vmem [shape: bf16[128,128], index: 4, kind: input, shape index: {}]   ;;  %s2078_s5 = inlined_call_operand.hbm [shape: bf16[128,384], index: 5, kind: input, shape index: {}]   ;;  %s2079_s6 = inlined_call_operand.hbm [shape: bf16[128,128], index: 6, kind: input, shape index: {}]   ;;  %s2080_s7 = inlined_call_operand.hbm [shape: bf16[128,128], index: 7, kind: input, shape index: {}]   ;;  %s2081_s8 = inlined_call_operand.vmem [shape: bf16[128,64], index: 8, kind: input, shape index: {}]   ;;  %s2082_s9 = inlined_call_operand.hbm [shape: bf16[64,256], index: 9, kind: input, shape index: {}]   ;;  %s2083_s10 = inlined_call_operand.hbm [shape: f32[1,768], index: 10, kind: input, shape index: {}]   ;;  %s2084_s11 = inlined_call_operand.hbm [shape: f32[16,256], index: 11, kind: output, shape index: {}]  }
   0x1   :  { %17 = vsyncpa [#allocation6], 0 }
   0x2   :  { %18 = vsyncpa [#allocation9], 0 }
   0x3   :  { %19 = vsyncpa [#allocation4], 0  ;;  %s1748_s17 = smov [#allocation5]   ;;  %s1608_s21 = scalar_lea.hbm %s2079_s6, 1024 }
   0x4   :  { %s47_s18 = sshll.u32 %s1748_s17, 4  ;;  %p1609_p0 = scmp.ne.s32.totalorder %s2079_s6, %s1608_s21  ;;  %s48_s18 = int_to_ptr.vmem [resolvable:$true] %s47_s18 }
   0x5   :  { %p1612_p1 = scmp.lt.u32.totalorder %s1608_s21, %s2079_s6 }
   0x7   :  { %p1614_p2 = pnand %p1612_p1, %p1609_p0 }
   0x9   :  { %1617 = shalt.err (!%p1614_p2)
}
   0xa   :  { %s1618_s26 = scalar_lea.vmem %s48_s18, 1024  ;;  %p1623_p4 = scmp.lt.s32.totalorder %s48_s18, %s48_s18 }
   0xb   :  { %p1619_p3 = scmp.ne.s32.totalorder %s48_s18, %s1618_s26  ;;  %p1624_p5 = scmp.lt.s32.totalorder %s1618_s26, %s1618_s26 }
   0xd   :  { %p1625_p6 = por %p1624_p5, %p1623_p4 }
   0xf   :  { %p1626_p7 = pnand %p1625_p6, %p1619_p3 }
  0x11   :  { %1629 = shalt.err (!%p1626_p7)
}
  0x12   :  { %s1749_s27 = smov 64   ;;  %s1750_s28 = smov 4  }
  0x13   :  { %53 = dma.hbm_to_vmem [thread:$0]  %s2079_s6, 1024, %s48_s18, [#allocation6], %s1749_s27, %s1749_s27, %s1750_s28  }
  0x14   :  { %s1751_s12 = smov [#allocation8]   ;;  %s1630_s16 = scalar_lea.hbm %s2082_s9, 1024 }
  0x15   :  { %s73_s13 = sshll.u32 %s1751_s12, 4  ;;  %p1631_p8 = scmp.ne.s32.totalorder %s2082_s9, %s1630_s16  ;;  %s74_s13 = int_to_ptr.vmem [resolvable:$true] %s73_s13 }
  0x16   :  { %p1634_p9 = scmp.lt.u32.totalorder %s1630_s16, %s2082_s9 }
  0x18   :  { %p1636_p10 = pnand %p1634_p9, %p1631_p8 }
  0x1a   :  { %1639 = shalt.err (!%p1636_p10)
}
  0x1b   :  { %s1640_s22 = scalar_lea.vmem %s74_s13, 1024  ;;  %p1645_p12 = scmp.lt.s32.totalorder %s74_s13, %s74_s13 }
  0x1c   :  { %p1641_p11 = scmp.ne.s32.totalorder %s74_s13, %s1640_s22  ;;  %p1646_p13 = scmp.lt.s32.totalorder %s1640_s22, %s1640_s22 }
  0x1e   :  { %p1647_p0 = por %p1646_p13, %p1645_p12 }
  0x20   :  { %p1648_p1 = pnand %p1647_p0, %p1641_p11 }
  0x22   :  { %1651 = shalt.err (!%p1648_p1)
}
  0x23   :  { %s1752_s6 = smov 128   ;;  %s1753_s18 = smov 8  }
  0x24   :  { %79 = dma.hbm_to_vmem [thread:$0]  %s2082_s9, 1024, %s74_s13, [#allocation9], %s1752_s6, %s1752_s6, %s1753_s18  }
  0x25   :  { %s1754_s25 = smov [#allocation2]   ;;  %s1652_s12 = scalar_lea.hbm %s2078_s5, 3072 }
  0x26   :  { %s35_s26 = sshll.u32 %s1754_s25, 4  ;;  %p1653_p2 = scmp.ne.s32.totalorder %s2078_s5, %s1652_s12  ;;  %s36_s26 = int_to_ptr.vmem [resolvable:$true] %s35_s26 }
  0x27   :  { %p1656_p3 = scmp.lt.u32.totalorder %s1652_s12, %s2078_s5 }
  0x29   :  { %p1658_p4 = pnand %p1656_p3, %p1653_p2 }
  0x2b   :  { %1661 = shalt.err (!%p1658_p4)
}
  0x2c   :  { %s1662_s19 = scalar_lea.vmem %s36_s26, 3072  ;;  %p1667_p6 = scmp.lt.s32.totalorder %s36_s26, %s36_s26 }
  0x2d   :  { %p1663_p5 = scmp.ne.s32.totalorder %s36_s26, %s1662_s19  ;;  %p1668_p7 = scmp.lt.s32.totalorder %s1662_s19, %s1662_s19 }
  0x2f   :  { %p1669_p8 = por %p1668_p7, %p1667_p6 }
  0x31   :  { %p1670_p9 = pnand %p1669_p8, %p1663_p5 }
  0x33   :  { %1673 = shalt.err (!%p1670_p9)
}
  0x34   :  { %s1755_s9 = smov 192   ;;  %s1756_s13 = smov 12  }
  0x35   :  { %41 = dma.hbm_to_vmem [thread:$0]  %s2078_s5, 3072, %s36_s26, [#allocation3], %s1755_s9, %s1755_s9, %s1756_s13  }
  0x36   :  { %s1757_s22 = smov [#allocation7]   ;;  %s1758_s18 = smov [#allocation10]  }
  0x37   :  { %s59_s6 = sshll.u32 %s1757_s22, 4  ;;  %s86_s23 = sshll.u32 %s1758_s18, 4  ;;  %s60_s6 = int_to_ptr.vmem [resolvable:$true] %s59_s6  ;;  %s87_s23 = int_to_ptr.vmem [resolvable:$true] %s86_s23 }
  0x38   :  { %s1674_s29 = scalar_lea.hbm %s2080_s7, 1024 }
  0x39   :  { %p1675_p10 = scmp.ne.s32.totalorder %s2080_s7, %s1674_s29  ;;  %p1678_p11 = scmp.lt.u32.totalorder %s1674_s29, %s2080_s7 }
  0x3b   :  { %p1680_p12 = pnand %p1678_p11, %p1675_p10 }
  0x3d   :  { %1683 = shalt.err (!%p1680_p12)
}
  0x3e   :  { %s1684_s5 = scalar_lea.vmem %s60_s6, 1024  ;;  %p1689_p0 = scmp.lt.s32.totalorder %s60_s6, %s60_s6 }
  0x3f   :  { %p1685_p13 = scmp.ne.s32.totalorder %s60_s6, %s1684_s5  ;;  %p1690_p1 = scmp.lt.s32.totalorder %s1684_s5, %s1684_s5 }
  0x41   :  { %p1691_p2 = por %p1690_p1, %p1689_p0 }
  0x43   :  { %p1692_p3 = pnand %p1691_p2, %p1685_p13 }
  0x45   :  { %1695 = shalt.err (!%p1692_p3)
}
  0x46   :  { %65 = dma.hbm_to_vmem [thread:$0]  %s2080_s7, 1024, %s60_s6, [#allocation6], %s1749_s27, %s1749_s27, %s1750_s28  }
  0x47   :  { %s1696_s9 = scalar_lea.hbm %s2083_s10, 96 }
  0x48   :  { %p1697_p4 = scmp.ne.s32.totalorder %s2083_s10, %s1696_s9  ;;  %p1700_p5 = scmp.lt.u32.totalorder %s1696_s9, %s2083_s10 }
  0x4a   :  { %p1702_p6 = pnand %p1700_p5, %p1697_p4 }
  0x4c   :  { %1705 = shalt.err (!%p1702_p6)
}
  0x4d   :  { %s1706_s18 = scalar_lea.vmem %s87_s23, 96  ;;  %p1711_p8 = scmp.lt.s32.totalorder %s87_s23, %s87_s23 }
  0x4e   :  { %p1707_p7 = scmp.ne.s32.totalorder %s87_s23, %s1706_s18  ;;  %p1712_p9 = scmp.lt.s32.totalorder %s1706_s18, %s1706_s18 }
  0x50   :  { %p1713_p10 = por %p1712_p9, %p1711_p8 }
  0x52   :  { %p1714_p11 = pnand %p1713_p10, %p1707_p7 }
  0x54   :  { %1717 = shalt.err (!%p1714_p11)
}
  0x55   :  { %89 = dma.hbm_to_vmem [thread:$0]  %s2083_s10, 96, %s87_s23, [#allocation9]  }
  0x56   :  { %1740 = dma.done.wait [#allocation3], 3072  }
  0x57   :  { %1741 = vsyncadd [#allocation3], 4294964224 }
  0x58   :  { %1742 = dma.done.wait [#allocation6], 2048  }
  0x59   :  { %1743 = vsyncadd [#allocation6], 4294965248 }
  0x5a   :  { %1744 = dma.done.wait [#allocation9], 1120  }
  0x5b   :  { %1745 = vsyncadd [#allocation9], 4294966176  ;;  %v1759_v0 = vmov 0.0   ;;  %vm1760_vm0 = vmmov 0   ;;  %v1507_v1 = vld [vmem:[%s2076_s3] sm:$0xff]   ;;  %v1508_v2 = vld [vmem:[%s2076_s3 + $0x8] sm:$0xff]  }
  0x5c   :  { %1356 = vmatprep.subr.bf16.mxu0 %v1759_v0  ;;  %1372 = vmatprep.mubr.msk.bf16.mxu0 %vm1760_vm0, %v1759_v0  ;;  %v1509_v3 = vld [vmem:[%s2076_s3 + $0x10] sm:$0xff]   ;;  %v1510_v4 = vld [vmem:[%s2076_s3 + $0x18] sm:$0xff]   ;;  %v1511_v5 = vld [vmem:[%s2076_s3 + $0x20] sm:$0xff]   ;;  %vm655_vm1 = vcmask 130048   ;;  %vm1133_vm2 = vcmask 523264  }
  0x5d   :  { %1376 = vmatprep.subr.bf16.mxu1 %v1759_v0  ;;  %1392 = vmatprep.mubr.msk.bf16.mxu1 %vm1760_vm0, %v1759_v0  ;;  %v1512_v6 = vld [vmem:[%s2076_s3 + $0x28] sm:$0xff]   ;;  %v1513_v7 = vld [vmem:[%s2076_s3 + $0x30] sm:$0xff]   ;;  %v1514_v8 = vld [vmem:[%s2076_s3 + $0x38] sm:$0xff]  }
  0x5e   :  { %1357 = vmatpush3.bf16.msra.mxu0 %v1507_v1  ;;  %v1515_v9 = vld [vmem:[%s2073_s0] sm:$0xff]   ;;  %v1517_v11 = vld [vmem:[%s2077_s4 + $0x8] sm:$0xff]   ;;  %v1518_v12 = vld [vmem:[%s2077_s4 + $0x10] sm:$0xff]  }
  0x5f   :  { %1358 = vmatprep.subr.bf16.mxu0 %v1759_v0  ;;  %v1516_v10 = vld [vmem:[%s2077_s4] sm:$0xff]   ;;  %v1519_v13 = vld [vmem:[%s2077_s4 + $0x18] sm:$0xff]   ;;  %v1521_v15 = vld [vmem:[%s2077_s4 + $0x28] sm:$0xff]  }
  0x60   :  { %1377 = vmatpush3.bf16.msra.mxu1 %v1516_v10  ;;  %v1520_v14 = vld [vmem:[%s2077_s4 + $0x20] sm:$0xff]   ;;  %v1522_v16 = vld [vmem:[%s2077_s4 + $0x30] sm:$0xff]   ;;  %v1523_v17 = vld [vmem:[%s2077_s4 + $0x38] sm:$0xff]  }
  0x61   :  { %1378 = vmatprep.subr.bf16.mxu1 %v1759_v0  ;;  %v1524_v18 = vld [vmem:[#allocation2] ss:$12 sps:$4 sm:$0xff]   ;;  %v1526_v19 = vld [vmem:[#allocation2 + $0x4] ss:$12 sps:$4 sm:$0xff]   ;;  %v1530_v20 = vld [vmem:[#allocation2 + $0x1c] ss:$12 sps:$4 sm:$0xff]  }
  0x62   :  { %1359 = vmatpush3.bf16.msra.mxu0 %v1508_v2  ;;  %v1528_v21 = vld [vmem:[#allocation2 + $0x18] ss:$12 sps:$4 sm:$0xff]   ;;  %v1534_v22 = vld [vmem:[#allocation2 + $0x34] ss:$12 sps:$4 sm:$0xff]   ;;  %v1532_v23 = vld [vmem:[#allocation2 + $0x30] ss:$12 sps:$4 sm:$0xff]  }
  0x63   :  { %1360 = vmatprep.subr.bf16.mxu0 %v1759_v0  ;;  %v1538_v24 = vld [vmem:[#allocation2 + $0x4c] ss:$12 sps:$4 sm:$0xff]   ;;  %v1536_v25 = vld [vmem:[#allocation2 + $0x48] ss:$12 sps:$4 sm:$0xff]   ;;  %v1542_v26 = vld [vmem:[#allocation2 + $0x64] ss:$12 sps:$4 sm:$0xff]  }
  0x64   :  { %1379 = vmatpush3.bf16.msra.mxu1 %v1517_v11  ;;  %v1540_v27 = vld [vmem:[#allocation2 + $0x60] ss:$12 sps:$4 sm:$0xff]   ;;  %v1546_v28 = vld [vmem:[#allocation2 + $0x7c] ss:$12 sps:$4 sm:$0xff]   ;;  %v1544_v29 = vld [vmem:[#allocation2 + $0x78] ss:$12 sps:$4 sm:$0xff]  }
  0x65   :  { %1380 = vmatprep.subr.bf16.mxu1 %v1759_v0  ;;  %v1550_v30 = vld [vmem:[#allocation2 + $0x94] ss:$12 sps:$4 sm:$0xff]   ;;  %v1548_v31 = vld [vmem:[#allocation2 + $0x90] ss:$12 sps:$4 sm:$0xff]   ;;  %v1535_v60 = vld [vmem:[#allocation2 + $0x38] ss:$12 sps:$4 sm:$0xff]  }
  0x66   :  { %1361 = vmatpush3.bf16.msra.mxu0 %v1509_v3  ;;  %v1219_v32 = vld [vmem:[#allocation10] ss:$0 sm:$0xff]  ;;  %v1527_v57 = vld [vmem:[#allocation2 + $0x8] ss:$12 sps:$4 sm:$0xff]   ;;  %v1539_v61 = vld [vmem:[#allocation2 + $0x50] ss:$12 sps:$4 sm:$0xff]  }
  0x67   :  { %1362 = vmatprep.subr.bf16.mxu0 %v1759_v0  ;;  %v1531_v59 = vld [vmem:[#allocation2 + $0x20] ss:$12 sps:$4 sm:$0xff]   ;;  %v1543_v62 = vld [vmem:[#allocation2 + $0x68] ss:$12 sps:$4 sm:$0xff]   ;;  %v1551_v1 = vld [vmem:[#allocation2 + $0x98] ss:$12 sps:$4 sm:$0xff]  }
  0x68   :  { %1381 = vmatpush3.bf16.msra.mxu1 %v1518_v12  ;;  %v1547_v63 = vld [vmem:[#allocation2 + $0x80] ss:$12 sps:$4 sm:$0xff]   ;;  %v1552_v3 = vld [vmem:[#allocation2 + $0xa8] ss:$12 sps:$4 sm:$0xff]  }
  0x69   :  { %1382 = vmatprep.subr.bf16.mxu1 %v1759_v0  ;;  %v1554_v2 = vld [vmem:[#allocation2 + $0xac] ss:$12 sps:$4 sm:$0xff]  }
  0x6a   :  { %1363 = vmatpush3.bf16.msra.mxu0 %v1510_v4  ;;  %v1555_v4 = vld [vmem:[#allocation2 + $0xb0] ss:$12 sps:$4 sm:$0xff]  }
  0x6b   :  { %1364 = vmatprep.subr.bf16.mxu0 %v1759_v0 }
  0x6c   :  { %1383 = vmatpush3.bf16.msra.mxu1 %v1519_v13 }
  0x6d   :  { %1384 = vmatprep.subr.bf16.mxu1 %v1759_v0 }
  0x6e   :  { %1365 = vmatpush3.bf16.msra.mxu0 %v1511_v5  ;;  %v1761_v5 = vmov 0  }
  0x6f   :  { %1366 = vmatprep.subr.bf16.mxu0 %v1759_v0  ;;  %1505 = vset.pattern.permute.xlu0 %v1761_v5 }
  0x70   :  { %1385 = vmatpush3.bf16.msra.mxu1 %v1520_v14  ;;  %1506 = vset.pattern.permute.xlu1 %v1761_v5 }
  0x71   :  { %1386 = vmatprep.subr.bf16.mxu1 %v1759_v0 }
  0x72   :  { %1367 = vmatpush3.bf16.msra.mxu0 %v1512_v6  ;;  %v1229_v6 = vld [vmem:[#allocation10 + $0x1] ss:$0 sm:$0xff] }
  0x73   :  { %1368 = vmatprep.subr.bf16.mxu0 %v1759_v0 }
  0x74   :  { %1387 = vmatpush3.bf16.msra.mxu1 %v1521_v15 }
  0x75   :  { %1388 = vmatprep.subr.bf16.mxu1 %v1759_v0 }
  0x76   :  { %1369 = vmatpush3.bf16.msra.mxu0 %v1513_v7 }
  0x77   :  { %1370 = vmatprep.subr.bf16.mxu0 %v1759_v0 }
  0x78   :  { %1389 = vmatpush3.bf16.msra.mxu1 %v1522_v16 }
  0x79   :  { %1390 = vmatprep.subr.bf16.mxu1 %v1759_v0 }
  0x7a   :  { %1371 = vmatpush3.bf16.msra.mxu0 %v1514_v8 }
  0x7b   :  { %521 = vmatprep.subr.bf16.mxu0 %v1526_v19 }
  0x7c   :  { %1391 = vmatpush3.bf16.msra.mxu1 %v1523_v17 }
  0x7d   :  { %1373 = vmatmul.mubr.bf16.vlgmr.msra.gmra.mrb[0].mxu0 %v1515_v9  ;;  %1396 = vmatprep.subr.bf16.mxu1 %v1759_v0 }
  0x7e   :  { %522 = vmatpush1.bf16.msra.mxu0 %v1524_v18  ;;  %553 = vmatprep.mubr.bf16.mxu0 %v1761_v5 }
  0x7f   :  { %523 = vmatprep.subr.bf16.mxu0 %v1530_v20 }
  0x82   :  { %524 = vmatpush1.bf16.msra.mxu0 %v1528_v21 }
  0x83   :  { %525 = vmatprep.subr.bf16.mxu0 %v1534_v22 }
  0x86   :  { %526 = vmatpush1.bf16.msra.mxu0 %v1532_v23 }
  0x87   :  { %527 = vmatprep.subr.bf16.mxu0 %v1538_v24 }
  0x8a   :  { %528 = vmatpush1.bf16.msra.mxu0 %v1536_v25 }
  0x8b   :  { %529 = vmatprep.subr.bf16.mxu0 %v1542_v26  ;;  %v651_v26 = vld [vmem:[%s2074_s1] sm:$0xff] }
  0x8e   :  { %530 = vmatpush1.bf16.msra.mxu0 %v1540_v27 }
  0x8f   :  { %531 = vmatprep.subr.bf16.mxu0 %v1546_v28 }
  0x92   :  { %532 = vmatpush1.bf16.msra.mxu0 %v1544_v29 }
  0x93   :  { %533 = vmatprep.subr.bf16.mxu0 %v1550_v30  ;;  %v652_v30 = vld [vmem:[%s2074_s1 + $0x8] sm:$0xff] }
  0x96   :  { %534 = vmatpush1.bf16.msra.mxu0 %v1548_v31 }
  0x97   :  { %535 = vmatprep.subr.bf16.mxu0 %v1554_v2  ;;  %v1567_v2 = vld [vmem:[#allocation7 + $0x18] sm:$0xff]  }
  0x9a   :  { %536 = vmatpush1.bf16.msra.mxu0 %v1552_v3  ;;  %v1568_v3 = vld [vmem:[#allocation7 + $0x20] sm:$0xff]  }
  0x9b   :  { %1428 = vmatprep.subr.bf16.mxu0 %v1759_v0 }
 0x150   :  { %v223_v33 = vpop.f32.mrb[0].mxu0 }
 0x151   :  { %v224_v34 = vadd.f32 %v1219_v32, %v223_v33  ;;  %v1374_v35 = vpop.f32.mrb[1].mxu0 }
 0x152   :  { %v226_v36 = vpop.f32.mrb[2].mxu0 }
 0x153   :  { %v230_v37 = vmul.f32 %v224_v34, %v224_v34  ;;  %v227_v38 = vadd.f32 %v1219_v32, %v226_v36  ;;  %v1375_v39 = vpop.f32.mrb[3].mxu0 }
 0x155   :  { %v232_v40 = vmul.f32 %v230_v37, %v224_v34  ;;  %v231_v41 = vmul.f32 %v227_v38, %v227_v38 }
 0x157   :  { %v234_v42 = vmul.f32 0.044715, %v232_v40  ;;  %v233_v43 = vmul.f32 %v231_v41, %v227_v38 }
 0x159   :  { %v236_v44 = vadd.f32 %v234_v42, %v224_v34  ;;  %v235_v45 = vmul.f32 0.044715, %v233_v43 }
 0x15b   :  { %v238_v46 = vmul.f32 0.7978846, %v236_v44  ;;  %v237_v47 = vadd.f32 %v235_v45, %v227_v38 }
 0x15d   :  { %1592 = vtanh.f32 %v238_v46  ;;  %v239_v48 = vmul.f32 0.7978846, %v237_v47  ;;  %v1556_v47 = vld [vmem:[#allocation5] sm:$0xff]  }
 0x15f   :  { %1594 = vtanh.f32 %v239_v48  ;;  %v1557_v48 = vld [vmem:[#allocation5 + $0x8] sm:$0xff]  }
 0x167   :  { %v1593_v49 = vpop.eup %1592 }
 0x168   :  { %v242_v50 = vadd.f32 1.0, %v1593_v49  ;;  %v1558_v49 = vld [vmem:[#allocation5 + $0x10] sm:$0xff]  }
 0x169   :  { %v1595_v51 = vpop.eup %1594 }
 0x16a   :  { %v243_v52 = vadd.f32 1.0, %v1595_v51  ;;  %v244_v53 = vmul.f32 0.5, %v242_v50  ;;  %v1559_v50 = vld [vmem:[#allocation5 + $0x18] sm:$0xff]   ;;  %v1560_v51 = vld [vmem:[#allocation5 + $0x20] sm:$0xff]  }
 0x16c   :  { %v245_v54 = vmul.f32 0.5, %v243_v52  ;;  %v246_v55 = vmul.f32 %v244_v53, %v224_v34  ;;  %v1561_v52 = vld [vmem:[#allocation5 + $0x28] sm:$0xff]   ;;  %v1562_v53 = vld [vmem:[#allocation5 + $0x30] sm:$0xff]  }
 0x16e   :  { %v247_v56 = vmul.f32 %v245_v54, %v227_v38 }
 0x170   :  { %v248_v58 = vpack.c.bf16 %v247_v56, %v246_v55 }
 0x172   :  { %1393 = vmatmul.mubr.bf16.vlgmr.msra.gmra.mrb[0].mxu1 %v248_v58 }
 0x173   :  { %1397 = vmatpush3.bf16.msra.mxu1 %v1527_v57  ;;  %1412 = vmatprep.mubr.msk.bf16.mxu1 %vm1760_vm0, %v1759_v0 }
 0x174   :  { %1398 = vmatprep.subr.bf16.mxu1 %v1759_v0 }
 0x177   :  { %1399 = vmatpush3.bf16.msra.mxu1 %v1531_v59 }
 0x178   :  { %1400 = vmatprep.subr.bf16.mxu1 %v1759_v0 }
 0x17b   :  { %1401 = vmatpush3.bf16.msra.mxu1 %v1535_v60 }
 0x17c   :  { %1402 = vmatprep.subr.bf16.mxu1 %v1759_v0 }
 0x17f   :  { %1403 = vmatpush3.bf16.msra.mxu1 %v1539_v61  ;;  %v1563_v61 = vld [vmem:[#allocation5 + $0x38] sm:$0xff]  }
 0x180   :  { %1404 = vmatprep.subr.bf16.mxu1 %v1759_v0 }
 0x183   :  { %1405 = vmatpush3.bf16.msra.mxu1 %v1543_v62  ;;  %v1564_v62 = vld [vmem:[#allocation7] sm:$0xff]  }
 0x184   :  { %1406 = vmatprep.subr.bf16.mxu1 %v1759_v0 }
 0x187   :  { %1407 = vmatpush3.bf16.msra.mxu1 %v1547_v63  ;;  %v1565_v63 = vld [vmem:[#allocation7 + $0x8] sm:$0xff]  }
 0x188   :  { %1408 = vmatprep.subr.bf16.mxu1 %v1759_v0 }
 0x18b   :  { %1409 = vmatpush3.bf16.msra.mxu1 %v1551_v1  ;;  %v1566_v1 = vld [vmem:[#allocation7 + $0x10] sm:$0xff]  }
 0x18c   :  { %1410 = vmatprep.subr.bf16.mxu1 %v1759_v0 }
 0x18f   :  { %1411 = vmatpush3.bf16.msra.mxu1 %v1555_v4  ;;  %v1569_v4 = vld [vmem:[#allocation7 + $0x28] sm:$0xff]  }
 0x190   :  { %1416 = vmatprep.subr.bf16.mxu1 %v1759_v0 }
 0x245   :  { %v353_v7 = vpop.f32.mrb[0].mxu1 }
 0x246   :  { %v1394_v8 = vpop.f32.mrb[1].mxu1  ;;  %v1977_v10 = vadd.f32 %v1229_v6, %v353_v7 }
 0x247   :  { %v356_v9 = vpop.f32.mrb[2].mxu1 }
 0x248   :  { %v1979_v11 = vadd.f32 %v1229_v6, %v356_v9  ;;  %v1395_v12 = vpop.f32.mrb[3].mxu1 }
 0x24a   :  { %v360_v13 = vpack.c.bf16 %v1979_v11, %v1977_v10 }
 0x24c   :  { %554 = vmatmul.mubr.bf16.vlgmr.msra.gmra.mrb[4].mxu0 %v360_v13  ;;  %1413 = vmatmul.mubr.bf16.vlgmr.msra.gmra.mrb[4].mxu1 %v360_v13  ;;  %v1570_v13 = vld [vmem:[#allocation7 + $0x30] sm:$0xff]  }
 0x24d   :  { %1418 = vmatprep.mubr.msk.bf16.mxu1 %vm1760_vm0, %v1759_v0  ;;  %1444 = vmatprep.mubr.msk.bf16.mxu0 %vm1760_vm0, %v1759_v0 }
 0x24e   :  { %1429 = vmatpush3.bf16.msra.mxu0 %v1556_v47 }
 0x24f   :  { %1430 = vmatprep.subr.bf16.mxu0 %v1759_v0 }
 0x252   :  { %1431 = vmatpush3.bf16.msra.mxu0 %v1557_v48 }
 0x253   :  { %1432 = vmatprep.subr.bf16.mxu0 %v1759_v0 }
 0x256   :  { %1433 = vmatpush3.bf16.msra.mxu0 %v1558_v49 }
 0x257   :  { %1434 = vmatprep.subr.bf16.mxu0 %v1759_v0 }
 0x25a   :  { %1435 = vmatpush3.bf16.msra.mxu0 %v1559_v50 }
 0x25b   :  { %1436 = vmatprep.subr.bf16.mxu0 %v1759_v0 }
 0x25e   :  { %1437 = vmatpush3.bf16.msra.mxu0 %v1560_v51 }
 0x25f   :  { %1438 = vmatprep.subr.bf16.mxu0 %v1759_v0 }
 0x262   :  { %1439 = vmatpush3.bf16.msra.mxu0 %v1561_v52 }
 0x263   :  { %1440 = vmatprep.subr.bf16.mxu0 %v1759_v0 }
 0x266   :  { %1441 = vmatpush3.bf16.msra.mxu0 %v1562_v53 }
 0x267   :  { %1442 = vmatprep.subr.bf16.mxu0 %v1759_v0 }
 0x26a   :  { %1443 = vmatpush3.bf16.msra.mxu0 %v1563_v61  ;;  %v1181_v61 = vld [vmem:[%s2075_s2 + $0x8] sm:$0xff] }
 0x26b   :  { %1468 = vmatprep.subr.bf16.mxu0 %v1759_v0 }
 0x31f   :  { %v555_v14 = vpop.f32.mrb[4].mxu0  ;;  %v598_v15 = vpop.f32.mrb[4].mxu1 }
 0x320   :  { %v557_v16 = vpop.f32.mrb[5].mxu0  ;;  %v1414_v17 = vpop.f32.mrb[5].mxu1 }
 0x321   :  { %v559_v18 = vpop.f32.mrb[6].mxu0  ;;  %v601_v19 = vpop.f32.mrb[6].mxu1 }
 0x322   :  { %v605_v20 = vpack.c.bf16 %v559_v18, %v555_v14  ;;  %v607_v21 = vpack.c.bf16 %v601_v19, %v598_v15  ;;  %v561_v22 = vpop.f32.mrb[7].mxu0  ;;  %v1415_v23 = vpop.f32.mrb[7].mxu1  ;;  %v1571_v14 = vld [vmem:[#allocation7 + $0x38] sm:$0xff]  }
 0x323   :  { %v606_v24 = vpack.c.bf16 %v561_v22, %v557_v16  ;;  %v1572_v22 = vld [vmem:[%s2081_s8] sm:$0xff]   ;;  %v1573_v23 = vld [vmem:[%s2081_s8 + $0x8] sm:$0xff]  }
 0x325   :  { %1417 = vmatpush3.bf16.xpose.msra.mxu1 %v606_v24  ;;  %v1577_v24 = vld [vmem:[%s2081_s8 + $0x28] sm:$0xff]  }
 0x326   :  { %1422 = vmatprep.subr.bf16.mxu1 %v1759_v0 }
 0x32c   :  { %1419 = vmatmul.mubr.bf16.vlgmr.msra.gmra.mrb[8].mxu1 %v605_v20 }
 0x32d   :  { %1423 = vmatpush3.bf16.msra.mxu1 %v607_v21  ;;  %1424 = vmatprep.mubr.msk.bf16.mxu1 %vm1760_vm0, %v1759_v0 }
 0x32e   :  { %1448 = vmatprep.subr.bf16.mxu1 %v1759_v0 }
 0x3ff   :  { %v642_v25 = vpop.f32.mrb[8].mxu1 }
 0x400   :  { %v649_v27 = vmul.f32 0.088388346, %v642_v25  ;;  %v1420_v28 = vpop.f32.mrb[9].mxu1  ;;  %v1578_v25 = vld [vmem:[%s2081_s8 + $0x30] sm:$0xff]  }
 0x401   :  { %v645_v29 = vpop.f32.mrb[10].mxu1  ;;  %v1582_v28 = vld [vmem:[#allocation8 + $0x4] ss:$8 sps:$4 sm:$0xff]  }
 0x402   :  { %v650_v31 = vmul.f32 0.088388346, %v645_v29  ;;  %v1421_v32 = vpop.f32.mrb[11].mxu1  ;;  %v653_v33 = vadd.f32 %v651_v26, %v649_v27  ;;  %v1579_v26 = vld [vmem:[%s2081_s8 + $0x38] sm:$0xff]   ;;  %v1580_v27 = vld [vmem:[#allocation8] ss:$8 sps:$4 sm:$0xff]  }
 0x403   :  { %v1585_v29 = vld [vmem:[#allocation8 + $0x14] ss:$8 sps:$4 sm:$0xff]   ;;  %v1586_v32 = vld [vmem:[#allocation8 + $0x20] ss:$8 sps:$4 sm:$0xff]  }
 0x404   :  { %v656_v34 = vsel %vm655_vm1, %v653_v33, -inf  ;;  %v654_v35 = vadd.f32 %v652_v30, %v650_v31  ;;  %v1583_v30 = vld [vmem:[#allocation8 + $0x10] ss:$8 sps:$4 sm:$0xff]   ;;  %v1588_v31 = vld [vmem:[#allocation8 + $0x24] ss:$8 sps:$4 sm:$0xff]  }
 0x405   :  { %657 = vmax.xlane.f32.xlu0 %v656_v34 }
 0x406   :  { %v659_v36 = vsel %vm655_vm1, %v654_v35, -inf }
 0x409   :  { %660 = vmax.xlane.f32.xlu0 %v659_v36 }
 0x492   :  { %v658_v37 = vpop.xlane.xlu0 %657 }
 0x493   :  { %v662_v38 = vsub.f32 %v653_v33, %v658_v37  ;;  %v1271_v33 = vld [vmem:[#allocation10 + $0x2] ss:$0 sm:$0xff] }
 0x495   :  { %v664_v39 = vmul.f32 1.442695, %v662_v38 }
 0x496   :  { %v661_v40 = vpop.xlane.xlu0 %660 }
 0x497   :  { %1596 = vpow2.f32 %v664_v39  ;;  %v663_v41 = vsub.f32 %v654_v35, %v661_v40 }
 0x499   :  { %v666_v42 = vmul.f32 1.442695, %v663_v41 }
 0x49b   :  { %1598 = vpow2.f32 %v666_v42 }
 0x4a1   :  { %v1597_v43 = vpop.eup %1596 }
 0x4a2   :  { %v668_v44 = vsel %vm655_vm1, %v1597_v43, 0.0 }
 0x4a3   :  { %669 = vadd.xlane.f32.xlu1 %v668_v44 }
 0x4a5   :  { %v1599_v45 = vpop.eup %1598 }
 0x4a6   :  { %v671_v46 = vsel %vm655_vm1, %v1599_v45, 0.0 }
 0x4a7   :  { %672 = vadd.xlane.f32.xlu1 %v671_v46 }
 0x4b8   :  { %1189 = vperm.xlu1 %1506, %v1181_v61  }
 0x530   :  { %v670_v54 = vpop.xlane.xlu1 %669 }
 0x531   :  { %1600 = vrcp.f32 %v670_v54 }
 0x534   :  { %v673_v55 = vpop.xlane.xlu1 %672 }
 0x535   :  { %1602 = vrcp.f32 %v673_v55 }
 0x53b   :  { %v1601_v56 = vpop.eup %1600 }
 0x53c   :  { %v675_v58 = vmul.f32 %v1601_v56, %v1597_v43 }
 0x53f   :  { %v1603_v57 = vpop.eup %1602 }
 0x540   :  { %v677_v59 = vmul.f32 %v1603_v57, %v1599_v45 }
 0x542   :  { %v678_v60 = vpack.c.bf16 %v677_v59, %v675_v58  ;;  %v1591_v58 = vld [vmem:[#allocation8 + $0x34] ss:$8 sps:$4 sm:$0xff]   ;;  %v1589_v59 = vld [vmem:[#allocation8 + $0x30] ss:$8 sps:$4 sm:$0xff]  }
 0x544   :  { %1425 = vmatmul.mubr.msk.bf16.vlgmr.msra.gmra.mrb[12].mxu1 %vm655_vm1, %v678_v60  ;;  %v1180_v60 = vld [vmem:[%s2075_s2] sm:$0xff]  ;;  %s1762_s2 = smov [#allocation11]  }
 0x545   :  { %1464 = vmatprep.mubr.msk.bf16.mxu1 %vm1760_vm0, %v1759_v0  ;;  %1449 = vmatpush3.bf16.msra.mxu1 %v1564_v62  ;;  %v1280_v62 = vld [vmem:[#allocation10 + $0x3] ss:$0 sm:$0xff]  ;;  %s1205_s23 = sshll.u32 %s1762_s2, 4  ;;  %s1206_s23 = int_to_ptr.vmem [resolvable:$true] %s1205_s23 }
 0x546   :  { %1450 = vmatprep.subr.bf16.mxu1 %v1759_v0  ;;  %1184 = vperm.xlu0 %1505, %v1180_v60   ;;  %s1718_s24 = scalar_lea.vmem %s1206_s23, 512  ;;  %p1723_p13 = scmp.lt.s32.totalorder %s1206_s23, %s1206_s23 }
 0x547   :  { %p1719_p12 = scmp.ne.s32.totalorder %s1206_s23, %s1718_s24  ;;  %p1724_p0 = scmp.lt.s32.totalorder %s1718_s24, %s1718_s24 }
 0x549   :  { %1451 = vmatpush3.bf16.msra.mxu1 %v1565_v63  ;;  %p1725_p1 = por %p1724_p0, %p1723_p13 }
 0x54a   :  { %1452 = vmatprep.subr.bf16.mxu1 %v1759_v0 }
 0x54b   :  { %p1726_p2 = pnand %p1725_p1, %p1719_p12 }
 0x54d   :  { %1453 = vmatpush3.bf16.msra.mxu1 %v1566_v1 }
 0x54e   :  { %1454 = vmatprep.subr.bf16.mxu1 %v1759_v0 }
 0x551   :  { %1455 = vmatpush3.bf16.msra.mxu1 %v1567_v2 }
 0x552   :  { %1456 = vmatprep.subr.bf16.mxu1 %v1759_v0 }
 0x555   :  { %1457 = vmatpush3.bf16.msra.mxu1 %v1568_v3 }
 0x556   :  { %1458 = vmatprep.subr.bf16.mxu1 %v1759_v0 }
 0x559   :  { %1459 = vmatpush3.bf16.msra.mxu1 %v1569_v4 }
 0x55a   :  { %1460 = vmatprep.subr.bf16.mxu1 %v1759_v0 }
 0x55d   :  { %1461 = vmatpush3.bf16.msra.mxu1 %v1570_v13  ;;  %v110_v13 = vld [vmem:[#allocation10 + $0x4] sm:$0x3] }
 0x55e   :  { %1462 = vmatprep.subr.bf16.mxu1 %v1759_v0 }
 0x561   :  { %1463 = vmatpush3.bf16.msra.mxu1 %v1571_v14 }
 0x562   :  { %1137 = vmatprep.subr.bf16.mxu1 %v1582_v28 }
 0x617   :  { %v716_v6 = vpop.f32.mrb[12].mxu1 }
 0x618   :  { %v1426_v7 = vpop.f32.mrb[13].mxu1 }
 0x619   :  { %v719_v8 = vpop.f32.mrb[14].mxu1 }
 0x61a   :  { %v723_v9 = vpack.c.bf16 %v719_v8, %v716_v6  ;;  %v1427_v12 = vpop.f32.mrb[15].mxu1  ;;  %v1083_v8 = vlaneseq }
 0x61c   :  { %1445 = vmatmul.mubr.bf16.vlgmr.msra.gmra.mrb[8].mxu0 %v723_v9  ;;  %v1084_v9 = vshrl.u32 %v1083_v8, 7 }
 0x61d   :  { %1484 = vmatprep.mubr.msk.bf16.mxu0 %vm1760_vm0, %v1759_v0  ;;  %1469 = vmatpush3.bf16.msra.mxu0 %v1572_v22 }
 0x61e   :  { %1470 = vmatprep.subr.bf16.mxu0 %v1759_v0  ;;  %v1085_v12 = vsub.s32 0, %v1084_v9  ;;  %v1089_v14 = vsub.s32 1, %v1084_v9 }
 0x621   :  { %1471 = vmatpush3.bf16.msra.mxu0 %v1573_v23  ;;  %v1190_v23 = vpop.permute.xlu1 %1189 }
 0x622   :  { %1472 = vmatprep.subr.bf16.mxu0 %v1759_v0 }
 0x6ef   :  { %v822_v15 = vpop.f32.mrb[8].mxu0 }
 0x6f0   :  { %v1446_v16 = vpop.f32.mrb[9].mxu0  ;;  %v829_v18 = vadd.f32 %v822_v15, %v1977_v10  ;;  %v1574_v10 = vld [vmem:[%s2081_s8 + $0x10] sm:$0xff]   ;;  %v1086_v15 = vrot.slane %v110_v13, %v1085_v12 }
 0x6f1   :  { %v825_v17 = vpop.f32.mrb[10].mxu0  ;;  %1473 = vmatpush3.bf16.msra.mxu0 %v1574_v10  ;;  %v1090_v16 = vrot.slane %v110_v13, %v1089_v14 }
 0x6f2   :  { %v830_v19 = vadd.f32 %v825_v17, %v1979_v11  ;;  %v1447_v20 = vpop.f32.mrb[11].mxu0  ;;  %1474 = vmatprep.subr.bf16.mxu0 %v1759_v0  ;;  %v1576_v11 = vld [vmem:[%s2081_s8 + $0x20] sm:$0xff]  }
 0x6f4   :  { %v831_v21 = vpack.c.bf16 %v830_v19, %v829_v18  ;;  %v1185_v18 = vpop.permute.xlu0 %1184 }
 0x6f6   :  { %1465 = vmatmul.mubr.bf16.vlgmr.msra.gmra.mrb[16].mxu1 %v831_v21 }
 0x6f7   :  { %1169 = vmatprep.mubr.bf16.mxu1 %v1761_v5  ;;  %v1575_v5 = vld [vmem:[%s2081_s8 + $0x18] sm:$0xff]   ;;  %1138 = vmatpush1.bf16.msra.mxu1 %v1580_v27 }
 0x6f8   :  { %1475 = vmatpush3.bf16.msra.mxu0 %v1575_v5  ;;  %1139 = vmatprep.subr.bf16.mxu1 %v1585_v29 }
 0x6f9   :  { %1476 = vmatprep.subr.bf16.mxu0 %v1759_v0 }
 0x6fb   :  { %1140 = vmatpush1.bf16.msra.mxu1 %v1583_v30 }
 0x6fc   :  { %1477 = vmatpush3.bf16.msra.mxu0 %v1576_v11  ;;  %1141 = vmatprep.subr.bf16.mxu1 %v1588_v31 }
 0x6fd   :  { %1478 = vmatprep.subr.bf16.mxu0 %v1759_v0 }
 0x6ff   :  { %1142 = vmatpush1.bf16.msra.mxu1 %v1586_v32 }
 0x700   :  { %1479 = vmatpush3.bf16.msra.mxu0 %v1577_v24  ;;  %1143 = vmatprep.subr.bf16.mxu1 %v1591_v58 }
 0x701   :  { %1480 = vmatprep.subr.bf16.mxu0 %v1759_v0 }
 0x703   :  { %1144 = vmatpush1.bf16.msra.mxu1 %v1589_v59 }
 0x704   :  { %1481 = vmatpush3.bf16.msra.mxu0 %v1578_v25 }
 0x705   :  { %1482 = vmatprep.subr.bf16.mxu0 %v1759_v0 }
 0x708   :  { %1483 = vmatpush3.bf16.msra.mxu0 %v1579_v26 }
 0x7c9   :  { %v936_v34 = vpop.f32.mrb[16].mxu1 }
 0x7ca   :  { %v937_v0 = vadd.f32 %v1271_v33, %v936_v34  ;;  %v1466_v35 = vpop.f32.mrb[17].mxu1 }
 0x7cb   :  { %v939_v36 = vpop.f32.mrb[18].mxu1 }
 0x7cc   :  { %v943_v37 = vmul.f32 %v937_v0, %v937_v0  ;;  %v940_v38 = vadd.f32 %v1271_v33, %v939_v36  ;;  %v1467_v39 = vpop.f32.mrb[19].mxu1 }
 0x7ce   :  { %v945_v40 = vmul.f32 %v943_v37, %v937_v0  ;;  %v944_v41 = vmul.f32 %v940_v38, %v940_v38 }
 0x7d0   :  { %v947_v42 = vmul.f32 0.044715, %v945_v40  ;;  %v946_v43 = vmul.f32 %v944_v41, %v940_v38 }
 0x7d2   :  { %v949_v44 = vadd.f32 %v947_v42, %v937_v0  ;;  %v948_v45 = vmul.f32 0.044715, %v946_v43 }
 0x7d4   :  { %v951_v46 = vmul.f32 0.7978846, %v949_v44  ;;  %v950_v47 = vadd.f32 %v948_v45, %v940_v38 }
 0x7d6   :  { %1604 = vtanh.f32 %v951_v46  ;;  %v952_v48 = vmul.f32 0.7978846, %v950_v47 }
 0x7d8   :  { %1606 = vtanh.f32 %v952_v48 }
 0x7e0   :  { %v1605_v49 = vpop.eup %1604 }
 0x7e1   :  { %v955_v50 = vadd.f32 1.0, %v1605_v49 }
 0x7e2   :  { %v1607_v51 = vpop.eup %1606 }
 0x7e3   :  { %v957_v52 = vmul.f32 0.5, %v955_v50  ;;  %v956_v53 = vadd.f32 1.0, %v1607_v51 }
 0x7e5   :  { %v958_v54 = vmul.f32 0.5, %v956_v53  ;;  %v959_v55 = vmul.f32 %v957_v52, %v937_v0 }
 0x7e7   :  { %v960_v56 = vmul.f32 %v958_v54, %v940_v38 }
 0x7e9   :  { %v961_v57 = vpack.c.bf16 %v960_v56, %v959_v55 }
 0x7eb   :  { %1485 = vmatmul.mubr.bf16.vlgmr.msra.gmra.mrb[12].mxu0 %v961_v57 }
 0x8be   :  { %v1066_v63 = vpop.f32.mrb[12].mxu0 }
 0x8bf   :  { %v1486_v1 = vpop.f32.mrb[13].mxu0  ;;  %v1067_v3 = vadd.f32 %v1280_v62, %v1066_v63 }
 0x8c0   :  { %v1069_v2 = vpop.f32.mrb[14].mxu0 }
 0x8c1   :  { %v1070_v4 = vadd.f32 %v1280_v62, %v1069_v2  ;;  %v1487_v6 = vpop.f32.mrb[15].mxu0 }
 0x8c3   :  { %v1073_v7 = vpack.c.bf16 %v1070_v4, %v1067_v3 }
 0x8c5   :  { %1297 = vmatmul.mubr.msk.bf16.vlgmr.msra.gmra.mrb[20].mxu1 %vm1133_vm2, %v1073_v7 }
 0x998   :  { %v1171_v17 = vpop.f32.mrb[20].mxu1 }
 0x999   :  { %v1172_v19 = vadd.f32 %v1171_v17, %v1086_v15  ;;  %v1173_v20 = vpop.f32.mrb[21].mxu1 }
 0x99a   :  { %v1174_v21 = vadd.f32 %v1173_v20, %v1090_v16  ;;  %v1175_v22 = vpop.f32.mrb[22].mxu1 }
 0x99b   :  { %v1192_v10 = vmul.f32 %v1185_v18, %v1172_v19  ;;  %v1176_v5 = vadd.f32 %v1175_v22, %v1086_v15  ;;  %v1177_v11 = vpop.f32.mrb[23].mxu1 }
 0x99c   :  { %v1193_v24 = vmul.f32 %v1185_v18, %v1174_v21  ;;  %v1178_v25 = vadd.f32 %v1177_v11, %v1090_v16 }
 0x99d   :  { %1196 = vst [vmem:[#allocation11] sm:$0xff] %v1192_v10  ;;  %v1194_v26 = vmul.f32 %v1190_v23, %v1176_v5 }
 0x99e   :  { %1197 = vst [vmem:[#allocation11 + $0x8] sm:$0xff] %v1193_v24  ;;  %v1195_v27 = vmul.f32 %v1190_v23, %v1178_v25 }
 0x99f   :  { %1198 = vst [vmem:[#allocation11 + $0x10] sm:$0xff] %v1194_v26 }
 0x9a0   :  { %1199 = vst [vmem:[#allocation11 + $0x18] sm:$0xff] %v1195_v27 }
 0x9a1   :  { %1729 = shalt.err (!%p1726_p2)
}
 0x9a2   :  { %s1730_s30 = scalar_lea.hbm %s2084_s11, 512 }
 0x9a3   :  { %p1731_p3 = scmp.ne.s32.totalorder %s2084_s11, %s1730_s30  ;;  %p1734_p4 = scmp.lt.u32.totalorder %s1730_s30, %s2084_s11 }
 0x9a5   :  { %p1736_p5 = pnand %p1734_p4, %p1731_p3 }
 0x9a7   :  { %1739 = shalt.err (!%p1736_p5)
}
 0x9a8   :  { %s1763_s1 = smov 256   ;;  %s1764_s5 = smov 16  }
 0x9a9   :  { %1211 = dma.vmem_to_hbm [thread:$0]  %s1206_s23, 512, %s2084_s11, [#allocation4], %s1763_s1, %s1763_s1, %s1764_s5  }
 0x9aa   :  { %1746 = dma.done.wait [#allocation4], 512  }
 0x9ab   :  { %1747 = vsyncadd [#allocation4], 4294966784 }
 0x9ac   :  { %1215 = vsyncpa [#allocation3], 1 }
 0x9ad   :  { %1216 = vsyncpa [#allocation6], 1 }
 0x9ae   :  { %1217 = vsyncpa [#allocation9], 1 }
 0x9af   :  { %1218 = vsyncpa [#allocation4], 1 }

</bundles_post_ra>
